<compile_context>
chip_gen: v7x
topology: tpu7x:2x2x1
jax: 0.10.0
libtpu: 0.0.40
codegen_flags: <defaults>
</compile_context>

<pallas_src>
import math

import jax
import jax.numpy as jnp
from jax.experimental import pallas as pl
from jax.experimental.pallas import tpu as pltpu

# ~2 MiB per pipelined buffer: 2 in + 2 out buffers => <= ~8 MiB VMEM total,
# safe on v5e (16 MiB default scoped), v6e (32 MiB) and v7x (64 MiB physical).
_PER_BUFFER_BYTES = 2 * 1024 * 1024


def _flatten_copy_kernel(x_ref, o_ref):
    # Pure lane-dense tile copy; all reshaping happens (for free) in the wrapper.
    o_ref[...] = x_ref[...]


def _sublane_multiple(dtype) -> int:
    """Dtype-aware sublane packing: f32->8, bf16/f16->16, int8/fp8->32."""
    return {4: 8, 2: 16, 1: 32}.get(jnp.dtype(dtype).itemsize, 8)


def _largest_aligned_divisor(dim: int, mult: int, cap: int):
    """Largest d with d | dim, d % mult == 0 and d <= cap (None if none)."""
    best = None
    top = min(dim, max(cap, mult))
    for d in range(mult, top + 1, mult):
        if dim % d == 0:
            best = d
    return best


def _round_up(v: int, m: int) -> int:
    return ((v + m - 1) // m) * m


def _plan_tiles(rows: int, cols: int, sub: int, itemsize: int, budget: int):
    """Exact (tr, tc) tiles for an aligned (rows, cols) slab, or None."""
    if rows % sub != 0 or cols % 128 != 0:
        return None
    max_tc = max(128, budget // (sub * itemsize))
    tc = _largest_aligned_divisor(cols, 128, max_tc)  # cols % 128 == 0 => exists
    max_tr = max(sub, budget // (tc * itemsize))
    tr = _largest_aligned_divisor(rows, sub, max_tr)  # rows % sub == 0 => exists
    return tr, tc


def flatten(x: jax.Array, *, use_kernel: bool = False,
            donate_input: bool = False) -> jax.Array:
    """Equivalent of torch `Flatten().forward(x)` (i.e. x.view(N, -1))."""
    n = x.shape[0]
    flat = math.prod(x.shape[1:]) if x.ndim > 1 else 1

    # Metadata-only reshape — this IS the op; zero HBM traffic.
    x2 = jnp.reshape(x, (n, flat))
    if not use_kernel:
        return x2

    itemsize = jnp.dtype(x.dtype).itemsize
    sub = _sublane_multiple(x.dtype)
    total = n * flat

    slab_shape = None
    tr = tc = None

    # 1) Exact aligned tiling directly on the (N, flat) view.
    plan = _plan_tiles(n, flat, sub, itemsize, _PER_BUFFER_BYTES)
    if plan is not None:
        slab_shape = (n, flat)
        tr, tc = plan
    else:
        # 2) Recast the contiguous byte stream as an aligned (R, L) slab
        #    (legal: the copy is element-order-preserving).  Fixes tiny
        #    batches (N < sub) and non-128-multiple flat dims without ever
        #    creating a giant full-dim block.
        lane_cap = max(128, _PER_BUFFER_BYTES // (sub * itemsize))
        best_l = None
        for lane in range(128, min(total, lane_cap) + 1, 128):
            if total % lane == 0 and (total // lane) % sub == 0:
                best_l = lane
        if best_l is not None:
            slab_shape = (total // best_l, best_l)
            tr, tc = _plan_tiles(slab_shape[0], slab_shape[1], sub,
                                 itemsize, _PER_BUFFER_BYTES)

    if slab_shape is None:
        # 3) Last resort: fixed (sub, 128)-aligned blocks + cdiv grid; Pallas
        #    masks the partial edge blocks.  Never a whole-array block.
        slab_shape = (n, flat)
        tc = min(512, _round_up(max(flat, 1), 128))
        tr_cap = max(sub, (_PER_BUFFER_BYTES // (tc * itemsize)) // sub * sub)
        tr = max(sub, min(_round_up(max(n, 1), sub), tr_cap))

    rows, cols = slab_shape
    slab = jnp.reshape(x2, slab_shape)
    grid = (pl.cdiv(rows, tr), pl.cdiv(cols, tc))

    extra = {}
    if donate_input:
        # Footprint win when used standalone inside a jit with a donatable input.
        extra["input_output_aliases"] = {0: 0}

    out = pl.pallas_call(
        _flatten_copy_kernel,
        out_shape=jax.ShapeDtypeStruct(slab_shape, x.dtype),
        grid=grid,
        in_specs=[pl.BlockSpec((tr, tc), lambda i, j: (i, j))],
        out_specs=pl.BlockSpec((tr, tc), lambda i, j: (i, j)),
        compiler_params=pltpu.CompilerParams(
            dimension_semantics=("parallel", "parallel"),
        ),
        cost_estimate=pl.CostEstimate(
            flops=0, transcendentals=0, bytes_accessed=2 * total * itemsize
        ),
        **extra,
    )(slab)

    return jnp.reshape(out, (n, flat))


if __name__ == "__main__":
    key = jax.random.PRNGKey(0)
    # NCHW: batch=2, channels=4, spatial=16x16  -> (2, 1024)
    x = jax.random.normal(key, (2, 4, 16, 16), dtype=jnp.float32)
    y_ref = x.reshape(x.shape[0], -1)

    # Default fast path: metadata-only reshape.
    y_fast = jax.block_until_ready(flatten(x))
    # Kernel path (fusion scenario): tiny batch -> aligned 1D-recast slab.
    y_kern = jax.block_until_ready(flatten(x, use_kernel=True))

    assert y_fast.shape == (2, 4 * 16 * 16) and y_fast.dtype == x.dtype
    assert y_kern.shape == (2, 4 * 16 * 16) and y_kern.dtype == x.dtype
    assert bool(jnp.array_equal(y_fast, y_ref))
    assert bool(jnp.array_equal(y_kern, y_ref))

    # Second small case exercising the aligned 2D path + dtype-aware sublane
    # multiple (bf16 -> 16): batch=16, flat=256.
    xb = jax.random.normal(jax.random.PRNGKey(0), (16, 4, 8, 8), dtype=jnp.bfloat16)
    yb = jax.block_until_ready(flatten(xb, use_kernel=True))
    assert yb.shape == (16, 256) and yb.dtype == xb.dtype
    assert bool(jnp.array_equal(yb, xb.reshape(16, -1)))

    print("KERNEL_OK")
</pallas_src>

<mosaic_0001>
module attributes {stable_mosaic.version = 11 : i64} {
  func.func @_flatten_copy_kernel(%arg0: i32, %arg1: i32, %arg2: memref<8x256xf32, #tpu.memory_space<vmem>>, %arg3: memref<8x256xf32, #tpu.memory_space<vmem>>) attributes {dimension_semantics = [#tpu.dimension_semantics<parallel>, #tpu.dimension_semantics<parallel>], iteration_bounds = array<i64: 1, 1>, scalar_prefetch = 0 : i64, scratch_operands = 0 : i64, tpu.core_type = #tpu.core_type<tc>, window_params = [{transform_indices = @transform_0, window_bounds = array<i64: 8, 256>}, {transform_indices = @transform_1, window_bounds = array<i64: 8, 256>}]} {
    %c0 = arith.constant 0 : index
    %c0_0 = arith.constant 0 : index
    %0 = vector.load %arg2[%c0, %c0_0] : memref<8x256xf32, #tpu.memory_space<vmem>>, vector<8x256xf32>
    %c0_1 = arith.constant 0 : index
    %c0_2 = arith.constant 0 : index
    %1 = vector.load %arg3[%c0_1, %c0_2] : memref<8x256xf32, #tpu.memory_space<vmem>>, vector<8x256xf32>
    tpu.vector_store %arg3[%c0_1, %c0_2], %0 {strides = array<i32>} : memref<8x256xf32, #tpu.memory_space<vmem>>, vector<8x256xf32>,
    return
  }
  func.func @transform_0(%arg0: i32, %arg1: i32) -> (i32, i32) {
    %c0_i32 = arith.constant 0 : i32
    return %arg0, %arg1 : i32, i32
  }
  func.func @transform_1(%arg0: i32, %arg1: i32) -> (i32, i32) {
    %c0_i32 = arith.constant 0 : i32
    return %arg0, %arg1 : i32, i32
  }
}

</mosaic_0001>

<bundles_post_ra>
// kernel: tpu_custom_call.1
= control target key start
LH: loop header
LB: loop body
LE: loop exit
PB: predicated region body
PF: predicated region fallthrough
CT: control target
= control target key end

     0   :  { %6 = vsyncpa [#allocation3], 0  ;;  %s126_s0 = inlined_call_operand.hbm [shape: f32[8,256], index: 0, kind: input, shape index: {}]   ;;  %s127_s1 = inlined_call_operand.hbm [shape: f32[8,256], index: 1, kind: output, shape index: {}]  }
   0x1   :  { %7 = vsyncpa [#allocation4], 0  ;;  %s90_s6 = smov [#allocation2]   ;;  %s42_s10 = scalar_lea.hbm %s126_s0, 256 }
   0x2   :  { %s14_s7 = sshll.u32 %s90_s6, 4  ;;  %p43_p0 = scmp.ne.s32.totalorder %s126_s0, %s42_s10  ;;  %s15_s7 = int_to_ptr.vmem [resolvable:$true] %s14_s7 }
   0x3   :  { %p46_p1 = scmp.lt.u32.totalorder %s42_s10, %s126_s0 }
   0x5   :  { %p48_p2 = pnand %p46_p1, %p43_p0 }
   0x7   :  { %51 = shalt.err (!%p48_p2)
}
   0x8   :  { %s52_s15 = scalar_lea.vmem %s15_s7, 256  ;;  %p57_p4 = scmp.lt.s32.totalorder %s15_s7, %s15_s7 }
   0x9   :  { %p53_p3 = scmp.ne.s32.totalorder %s15_s7, %s52_s15  ;;  %p58_p5 = scmp.lt.s32.totalorder %s52_s15, %s52_s15 }
   0xb   :  { %p59_p6 = por %p58_p5, %p57_p4 }
   0xd   :  { %p60_p7 = pnand %p59_p6, %p53_p3 }
   0xf   :  { %63 = shalt.err (!%p60_p7)
}
  0x10   :  { %17 = dma.hbm_to_vmem [thread:$0]  %s126_s0, 256, %s15_s7, [#allocation3]  }
  0x11   :  { %86 = dma.done.wait [#allocation3], 256  }
  0x12   :  { %87 = vsyncadd [#allocation3], 4294967040  ;;  %s91_s18 = smov [#allocation5]   ;;  %v21_v0 = vld [vmem:[#allocation2] sm:$0xff]  ;;  %v22_v1 = vld [vmem:[#allocation2 + $0x8] sm:$0xff] }
  0x13   :  { %s31_s19 = sshll.u32 %s91_s18, 4  ;;  %23 = vst [vmem:[#allocation5] sm:$0xff] %v21_v0  ;;  %24 = vst [vmem:[#allocation5 + $0x8] sm:$0xff] %v22_v1  ;;  %s32_s19 = int_to_ptr.vmem [resolvable:$true] %s31_s19 }
  0x14   :  { %s64_s20 = scalar_lea.vmem %s32_s19, 256  ;;  %p69_p9 = scmp.lt.s32.totalorder %s32_s19, %s32_s19 }
  0x15   :  { %p65_p8 = scmp.ne.s32.totalorder %s32_s19, %s64_s20  ;;  %p70_p10 = scmp.lt.s32.totalorder %s64_s20, %s64_s20 }
  0x17   :  { %p71_p11 = por %p70_p10, %p69_p9 }
  0x19   :  { %p72_p12 = pnand %p71_p11, %p65_p8 }
  0x1b   :  { %75 = shalt.err (!%p72_p12)
}
  0x1c   :  { %s76_s0 = scalar_lea.hbm %s127_s1, 256 }
  0x1d   :  { %p77_p13 = scmp.ne.s32.totalorder %s127_s1, %s76_s0  ;;  %p80_p0 = scmp.lt.u32.totalorder %s76_s0, %s127_s1 }
  0x1f   :  { %p82_p1 = pnand %p80_p0, %p77_p13 }
  0x21   :  { %85 = shalt.err (!%p82_p1)
}
  0x22   :  { %34 = dma.vmem_to_hbm [thread:$0]  %s32_s19, 256, %s127_s1, [#allocation4]  }
  0x23   :  { %88 = dma.done.wait [#allocation4], 256  }
  0x24   :  { %89 = vsyncadd [#allocation4], 4294967040 }
  0x25   :  { %38 = vsyncpa [#allocation3], 1 }
  0x26   :  { %39 = vsyncpa [#allocation4], 1 }

</bundles_post_ra>
